<compile_context>
chip_gen: v6e
topology: v6e:2x2x1
jax: 0.10.0
libtpu: 0.0.40
codegen_flags: <defaults>
</compile_context>

<pallas_src>
import math

import jax
import jax.numpy as jnp
from jax.experimental import pallas as pl
from jax.experimental.pallas import tpu as pltpu

_LANE = 128
_KTILE_WEIGHT_VMEM_BYTES = 4 * 1024 * 1024  # split K when the resident weight tile exceeds this


def _round_up(x, m):
    return ((x + m - 1) // m) * m


def _fused_kernel(x_ref, w_ref, b_ref, o_ref):
    # x_ref: (TM, Cin)  w_ref: (Cin, Nout)  b_ref: (1, Nout) f32  o_ref: (TM, Nout)
    y = jnp.dot(x_ref[...], w_ref[...], preferred_element_type=jnp.float32)
    y = y + b_ref[...]
    o_ref[...] = jnp.maximum(y, 0.0).astype(o_ref.dtype)


def _fused_kernel_ktiled(x_ref, w_ref, b_ref, o_ref, acc_ref):
    # Same computation with the reduction (Cin) split over a trailing "arbitrary" grid axis.
    k = pl.program_id(1)

    @pl.when(k == 0)
    def _():
        acc_ref[...] = jnp.zeros_like(acc_ref)

    acc_ref[...] += jnp.dot(x_ref[...], w_ref[...], preferred_element_type=jnp.float32)

    @pl.when(k == pl.num_programs(1) - 1)
    def _():
        y = acc_ref[...] + b_ref[...]
        o_ref[...] = jnp.maximum(y, 0.0).astype(o_ref.dtype)


def _choose_tm(M, tile_m):
    if M <= 256:
        return M  # single full-extent block (legal regardless of divisibility)
    # >=2 grid steps (even where possible) so v7x megacore + the auto pipeline engage;
    # 256-row alignment keeps MXU passes full on v5e/v6e/v7x.
    return min(tile_m, _round_up(pl.cdiv(M, 2), 256))


def _choose_tk(Cin, Nout, itemsize):
    # Resident VMEM footprint of the weight tile (last dim is lane-padded to 128).
    w_vmem = Cin * _round_up(Nout, _LANE) * itemsize
    if w_vmem <= _KTILE_WEIGHT_VMEM_BYTES:
        return Cin
    for tk in (2048, 1024, 512, 256, 128):
        if tk < Cin and Cin % tk == 0:
            if tk * _round_up(Nout, _LANE) * itemsize <= _KTILE_WEIGHT_VMEM_BYTES:
                return tk
    return Cin  # Cin not 128-divisible: keep weight resident (compile-time VMEM guard)


def model_forward(x1, x2, weight, bias, *, tile_m=512):
    """relu(Linear(x2) - x1).  x1:(N1,), x2:(..., Cin), weight:(Cout, Cin), bias:(Cout,)."""
    *lead, Cin = x2.shape
    Cout, Cin_w = weight.shape
    if Cin_w != Cin:
        raise ValueError(f"Linear in_features {Cin_w} != x2 last dim {Cin}")
    N1 = x1.shape[0]
    # torch/numpy broadcast rules for (..., Cout) - (N1,)
    if not (Cout == N1 or Cout == 1 or N1 == 1):
        raise ValueError(f"Cannot broadcast linear output width {Cout} against x1 width {N1}")
    Nout = max(Cout, N1)

    M = math.prod(lead) if lead else 1
    out_dtype = jnp.result_type(x2.dtype, weight.dtype, bias.dtype, x1.dtype)

    # Keep activations in their native dtype (x is the only O(M) input).
    x_flat = x2.reshape(M, Cin)
    compute_dtype = x_flat.dtype

    # Fold the x1 broadcast and the bias into the matmul epilogue:
    #   out = relu(x @ W_eff + (bias - x1))
    w_t = weight.T.astype(compute_dtype)                          # (Cin, Cout)
    w_eff = w_t if Cout == Nout else jnp.tile(w_t, (1, Nout))     # (Cin, Nout)
    b_eff = (jnp.broadcast_to(bias.astype(jnp.float32), (Nout,))
             - jnp.broadcast_to(x1.astype(jnp.float32), (Nout,))).reshape(1, Nout)

    itemsize = jnp.dtype(compute_dtype).itemsize
    tm = _choose_tm(M, tile_m)
    grid_m = pl.cdiv(M, tm)
    tk = _choose_tk(Cin, Nout, itemsize)
    grid_k = pl.cdiv(Cin, tk)

    out_bytes = jnp.dtype(out_dtype).itemsize
    cost = pl.CostEstimate(
        flops=2 * M * Cin * Nout,
        transcendentals=0,
        bytes_accessed=(M * Cin * itemsize + Cin * Nout * itemsize
                        + Nout * 4 + M * Nout * out_bytes),
    )

    if grid_k == 1:
        out_flat = pl.pallas_call(
            _fused_kernel,
            out_shape=jax.ShapeDtypeStruct((M, Nout), out_dtype),
            grid=(grid_m,),
            in_specs=[
                pl.BlockSpec((tm, Cin), lambda i: (i, 0)),      # activation tiles stream
                pl.BlockSpec((Cin, Nout), lambda i: (0, 0)),    # effective weight: grid-invariant
                pl.BlockSpec((1, Nout), lambda i: (0, 0)),      # fused bias - x1: grid-invariant
            ],
            out_specs=pl.BlockSpec((tm, Nout), lambda i: (i, 0)),
            compiler_params=pltpu.CompilerParams(
                dimension_semantics=("parallel",)),
            cost_estimate=cost,
        )(x_flat, w_eff, b_eff)
    else:
        out_flat = pl.pallas_call(
            _fused_kernel_ktiled,
            out_shape=jax.ShapeDtypeStruct((M, Nout), out_dtype),
            grid=(grid_m, grid_k),                              # reduction axis last
            in_specs=[
                pl.BlockSpec((tm, tk), lambda i, k: (i, k)),
                pl.BlockSpec((tk, Nout), lambda i, k: (k, 0)),
                pl.BlockSpec((1, Nout), lambda i, k: (0, 0)),
            ],
            out_specs=pl.BlockSpec((tm, Nout), lambda i, k: (i, 0)),
            scratch_shapes=[pltpu.VMEM((tm, Nout), jnp.float32)],
            compiler_params=pltpu.CompilerParams(
                dimension_semantics=("parallel", "arbitrary")),
            cost_estimate=cost,
        )(x_flat, w_eff, b_eff)

    return out_flat.reshape(*lead, Nout)


if __name__ == "__main__":
    # Shapes consistent with the module spec: x2 = (1, 3, 64, 64) with the Linear acting on
    # the last dim, x1 = randn(3) broadcasting against the linear output's last dim.
    # TODO(synk): the spec constructs Linear(1, 1) which cannot consume a 64-wide last dim in
    # torch; we use in_features=64 (x2's last dim) as the consistent interpretation.
    in_features = 64
    out_features = 1
    N1 = 3

    key = jax.random.PRNGKey(0)
    k1, k2, k3, k4 = jax.random.split(key, 4)

    x1 = jax.random.normal(k1, (N1,), dtype=jnp.float32)
    x2 = jax.random.normal(k2, (1, 3, 64, in_features), dtype=jnp.float32)
    weight = jax.random.normal(k3, (out_features, in_features), dtype=jnp.float32) * 0.1
    bias = jax.random.normal(k4, (out_features,), dtype=jnp.float32) * 0.1

    fwd = jax.jit(model_forward)      # fuses weight/bias prep + reshape with the pallas_call
    out = fwd(x1, x2, weight, bias)
    jax.block_until_ready(out)

    # Pure-JAX reference with the same semantics as the torch module.
    ref = jnp.maximum((x2 @ weight.T + bias) - x1, 0.0)
    assert out.shape == ref.shape, (out.shape, ref.shape)
    assert jnp.allclose(out, ref, atol=1e-5, rtol=1e-5), float(jnp.max(jnp.abs(out - ref)))

    print("KERNEL_OK")
</pallas_src>

<mosaic_0001>
module attributes {stable_mosaic.version = 11 : i64} {
  func.func @_fused_kernel(%arg0: i32, %arg1: memref<192x64xf32, #tpu.memory_space<vmem>>, %arg2: memref<64x3xf32, #tpu.memory_space<vmem>>, %arg3: memref<1x3xf32, #tpu.memory_space<vmem>>, %arg4: memref<192x3xf32, #tpu.memory_space<vmem>>) attributes {dimension_semantics = [#tpu.dimension_semantics<parallel>], iteration_bounds = array<i64: 1>, scalar_prefetch = 0 : i64, scratch_operands = 0 : i64, tpu.core_type = #tpu.core_type<tc>, window_params = [{transform_indices = @transform_0, window_bounds = array<i64: 192, 64>}, {pipeline_mode = #tpu.pipeline_mode<synchronous>, transform_indices = @transform_1, window_bounds = array<i64: 64, 3>}, {pipeline_mode = #tpu.pipeline_mode<synchronous>, transform_indices = @transform_2, window_bounds = array<i64: 1, 3>}, {transform_indices = @transform_3, window_bounds = array<i64: 192, 3>}]} {
    %c0 = arith.constant 0 : index
    %c0_0 = arith.constant 0 : index
    %0 = vector.load %arg1[%c0, %c0_0] : memref<192x64xf32, #tpu.memory_space<vmem>>, vector<192x64xf32>
    %c0_1 = arith.constant 0 : index
    %c0_2 = arith.constant 0 : index
    %1 = vector.load %arg2[%c0_1, %c0_2] : memref<64x3xf32, #tpu.memory_space<vmem>>, vector<64x3xf32>
    %cst = arith.constant dense<0.000000e+00> : vector<192x3xf32>
    %2 = tpu.matmul %0, %1, %cst {dimension_numbers = #tpu.dot_dimension_numbers<[1], [0], [0], [1], [0, 0, 1, 1], [], []>} : vector<192x64xf32>, vector<64x3xf32>, vector<192x3xf32> -> vector<192x3xf32>
    %c0_3 = arith.constant 0 : index
    %c0_4 = arith.constant 0 : index
    %3 = vector.load %arg3[%c0_3, %c0_4] : memref<1x3xf32, #tpu.memory_space<vmem>>, vector<1x3xf32>
    %4 = vector.broadcast %3 : vector<1x3xf32> to vector<192x3xf32>
    %5 = arith.addf %2, %4 : vector<192x3xf32>
    %cst_5 = arith.constant 0.000000e+00 : f32
    %6 = vector.broadcast %cst_5 : f32 to vector<192x3xf32>
    %7 = arith.maximumf %5, %6 : vector<192x3xf32>
    %c0_6 = arith.constant 0 : index
    %c0_7 = arith.constant 0 : index
    %8 = vector.load %arg4[%c0_6, %c0_7] : memref<192x3xf32, #tpu.memory_space<vmem>>, vector<192x3xf32>
    tpu.vector_store %arg4[%c0_6, %c0_7], %7 {strides = array<i32>} : memref<192x3xf32, #tpu.memory_space<vmem>>, vector<192x3xf32>,
    return
  }
  func.func @transform_0(%arg0: i32) -> (i32, i32) {
    %c0_i32 = arith.constant 0 : i32
    %c0_i32_0 = arith.constant 0 : i32
    return %arg0, %c0_i32 : i32, i32
  }
  func.func @transform_1(%arg0: i32) -> (i32, i32) {
    %c0_i32 = arith.constant 0 : i32
    %c0_i32_0 = arith.constant 0 : i32
    %c0_i32_1 = arith.constant 0 : i32
    return %c0_i32, %c0_i32_0 : i32, i32
  }
  func.func @transform_2(%arg0: i32) -> (i32, i32) {
    %c0_i32 = arith.constant 0 : i32
    %c0_i32_0 = arith.constant 0 : i32
    %c0_i32_1 = arith.constant 0 : i32
    return %c0_i32, %c0_i32_0 : i32, i32
  }
  func.func @transform_3(%arg0: i32) -> (i32, i32) {
    %c0_i32 = arith.constant 0 : i32
    %c0_i32_0 = arith.constant 0 : i32
    return %arg0, %c0_i32 : i32, i32
  }
}

</mosaic_0001>

<bundles_post_ra>
// kernel: model_forward.1
= control target key start
LH: loop header
LB: loop body
LE: loop exit
PB: predicated region body
PF: predicated region fallthrough
CT: control target
= control target key end

     0   :  { %8 = vsyncpa [#allocation3], 0  ;;  %s529_s12 = smov [#allocation2]   ;;  %s728_s0 = inlined_call_operand.hbm [shape: f32[192,64], index: 0, kind: input, shape index: {}]   ;;  %s729_s1 = inlined_call_operand.vmem [shape: f32[64,3], index: 1, kind: input, shape index: {}]   ;;  %s730_s2 = inlined_call_operand.vmem [shape: f32[1,3], index: 2, kind: input, shape index: {}]   ;;  %s731_s3 = inlined_call_operand.vmem [shape: f32[192,3], index: 3, kind: output, shape index: {}]  }
   0x1   :  { %s14_s13 = sshll.u32 %s529_s12, 4  ;;  %s15_s13 = int_to_ptr.vmem [resolvable:$true] %s14_s13 }
   0x2   :  { %s515_s14 = scalar_lea.vmem %s15_s13, 3072  ;;  %p520_p1 = scmp.lt.s32.totalorder %s15_s13, %s15_s13 }
   0x3   :  { %p516_p0 = scmp.ne.s32.totalorder %s15_s13, %s515_s14  ;;  %p521_p2 = scmp.lt.s32.totalorder %s515_s14, %s515_s14 }
   0x5   :  { %p522_p3 = por %p521_p2, %p520_p1 }
   0x7   :  { %p523_p4 = pnand %p522_p3, %p516_p0 }
   0x9   :  { %526 = shalt.err (!%p523_p4)
}
   0xa   :  { %s530_s15 = smov 128   ;;  %s531_s16 = smov 8  }
   0xb   :  { %20 = dma.hbm_to_vmem [thread:$0]  %s728_s0, 3072, %s15_s13, [#allocation3], %s530_s15, %s530_s15, %s531_s16  }
   0xc   :  { %527 = dma.done.wait [#allocation3], 3072  }
   0xd   :  { %528 = vsyncadd [#allocation3], 4294964224  ;;  %v59_v0 = vld [vmem:[%s729_s1 + $0x38] sm:$0xff]  ;;  %v58_v1 = vld [vmem:[%s729_s1 + $0x30] sm:$0xff]  ;;  %vm67_vm0 = vcmask 523264   ;;  %vm349_vm1 = vcmask 23552  }
   0xe   :  { %436 = vmatprep.subr.mxu0 %v59_v0  ;;  %488 = vmatprep.subr.mxu1 %v59_v0  ;;  %v57_v2 = vld [vmem:[%s729_s1 + $0x28] sm:$0xff]  ;;  %v56_v3 = vld [vmem:[%s729_s1 + $0x20] sm:$0xff]  ;;  %v55_v4 = vld [vmem:[%s729_s1 + $0x18] sm:$0xff] }
   0xf   :  { %437 = vmatpush3.msra.mxu0 %v59_v0  ;;  %496 = vmatpush3.msra.mxu1 %v59_v0  ;;  %v54_v5 = vld [vmem:[%s729_s1 + $0x10] sm:$0xff]  ;;  %v53_v6 = vld [vmem:[%s729_s1 + $0x8] sm:$0xff]  ;;  %v52_v7 = vld [vmem:[%s729_s1] sm:$0xff] }
  0x10   :  { %438 = vmatprep.subr.mxu0 %v58_v1  ;;  %489 = vmatprep.subr.mxu1 %v58_v1  ;;  %v28_v8 = vld [vmem:[#allocation2] sm:$0xff]  ;;  %v29_v10 = vld [vmem:[#allocation2 + $0x8] sm:$0xff]  ;;  %v30_v12 = vld [vmem:[#allocation2 + $0x10] sm:$0xff] }
  0x11   :  { %439 = vmatpush3.msra.mxu0 %v58_v1  ;;  %497 = vmatpush3.msra.mxu1 %v58_v1  ;;  %v40_v9 = vld [vmem:[#allocation2 + $0x60] sm:$0xff]  ;;  %v41_v11 = vld [vmem:[#allocation2 + $0x68] sm:$0xff]  ;;  %v42_v13 = vld [vmem:[#allocation2 + $0x70] sm:$0xff] }
  0x12   :  { %440 = vmatprep.subr.mxu0 %v57_v2  ;;  %490 = vmatprep.subr.mxu1 %v57_v2  ;;  %v31_v14 = vld [vmem:[#allocation2 + $0x18] sm:$0xff]  ;;  %v32_v16 = vld [vmem:[#allocation2 + $0x20] sm:$0xff]  ;;  %v33_v18 = vld [vmem:[#allocation2 + $0x28] sm:$0xff] }
  0x13   :  { %441 = vmatpush3.msra.mxu0 %v57_v2  ;;  %498 = vmatpush3.msra.mxu1 %v57_v2  ;;  %v43_v15 = vld [vmem:[#allocation2 + $0x78] sm:$0xff]  ;;  %v44_v17 = vld [vmem:[#allocation2 + $0x80] sm:$0xff]  ;;  %v45_v19 = vld [vmem:[#allocation2 + $0x88] sm:$0xff] }
  0x14   :  { %442 = vmatprep.subr.mxu0 %v56_v3  ;;  %491 = vmatprep.subr.mxu1 %v56_v3  ;;  %v34_v20 = vld [vmem:[#allocation2 + $0x30] sm:$0xff]  ;;  %v35_v22 = vld [vmem:[#allocation2 + $0x38] sm:$0xff]  ;;  %v36_v24 = vld [vmem:[#allocation2 + $0x40] sm:$0xff] }
  0x15   :  { %443 = vmatpush3.msra.mxu0 %v56_v3  ;;  %499 = vmatpush3.msra.mxu1 %v56_v3  ;;  %v46_v21 = vld [vmem:[#allocation2 + $0x90] sm:$0xff]  ;;  %v47_v23 = vld [vmem:[#allocation2 + $0x98] sm:$0xff]  ;;  %v48_v25 = vld [vmem:[#allocation2 + $0xa0] sm:$0xff] }
  0x16   :  { %444 = vmatprep.subr.mxu0 %v55_v4  ;;  %492 = vmatprep.subr.mxu1 %v55_v4  ;;  %v37_v26 = vld [vmem:[#allocation2 + $0x48] sm:$0xff]  ;;  %v38_v28 = vld [vmem:[#allocation2 + $0x50] sm:$0xff]  ;;  %v39_v30 = vld [vmem:[#allocation2 + $0x58] sm:$0xff] }
  0x17   :  { %445 = vmatpush3.msra.mxu0 %v55_v4  ;;  %500 = vmatpush3.msra.mxu1 %v55_v4  ;;  %v49_v27 = vld [vmem:[#allocation2 + $0xa8] sm:$0xff]  ;;  %v50_v29 = vld [vmem:[#allocation2 + $0xb0] sm:$0xff]  ;;  %v51_v31 = vld [vmem:[#allocation2 + $0xb8] sm:$0xff] }
  0x18   :  { %446 = vmatprep.subr.mxu0 %v54_v5  ;;  %493 = vmatprep.subr.mxu1 %v54_v5  ;;  %v606_v32 = vld [vmem:[%s730_s2] ss:$0 sm:$0xff] }
  0x19   :  { %447 = vmatpush3.msra.mxu0 %v54_v5  ;;  %501 = vmatpush3.msra.mxu1 %v54_v5 }
  0x1a   :  { %448 = vmatprep.subr.mxu0 %v53_v6  ;;  %494 = vmatprep.subr.mxu1 %v53_v6 }
  0x1b   :  { %449 = vmatpush3.msra.mxu0 %v53_v6  ;;  %502 = vmatpush3.msra.mxu1 %v53_v6 }
  0x1c   :  { %450 = vmatprep.subr.mxu0 %v52_v7  ;;  %495 = vmatprep.subr.mxu1 %v52_v7 }
  0x1d   :  { %451 = vmatpush3.msra.mxu0 %v52_v7  ;;  %503 = vmatpush3.msra.mxu1 %v52_v7 }
  0x1e   :  { %452 = vmatprep.mubr.msk.f32.mxu0 %vm67_vm0, %v28_v8  ;;  %470 = vmatprep.mubr.msk.f32.mxu1 %vm67_vm0, %v40_v9 }
  0x1f   :  { %453 = vmatmul.mubr.msk.f32.vlgmr.msra.gmra.mxu0 %vm67_vm0, %v29_v10  ;;  %471 = vmatmul.mubr.msk.f32.vlgmr.msra.gmra.mxu1 %vm67_vm0, %v41_v11 }
  0x20   :  { %455 = vmatprep.mubr.msk.f32.mxu0 %vm67_vm0, %v30_v12  ;;  %473 = vmatprep.mubr.msk.f32.mxu1 %vm67_vm0, %v42_v13 }
  0x23   :  { %456 = vmatmul.mubr.msk.f32.gmra.mxu0 %vm67_vm0, %v31_v14  ;;  %474 = vmatmul.mubr.msk.f32.gmra.mxu1 %vm67_vm0, %v43_v15 }
  0x24   :  { %458 = vmatprep.mubr.msk.f32.mxu0 %vm67_vm0, %v32_v16  ;;  %476 = vmatprep.mubr.msk.f32.mxu1 %vm67_vm0, %v44_v17 }
  0x27   :  { %459 = vmatmul.mubr.msk.f32.gmra.mxu0 %vm67_vm0, %v33_v18  ;;  %477 = vmatmul.mubr.msk.f32.gmra.mxu1 %vm67_vm0, %v45_v19 }
  0x28   :  { %461 = vmatprep.mubr.msk.f32.mxu0 %vm67_vm0, %v34_v20  ;;  %479 = vmatprep.mubr.msk.f32.mxu1 %vm67_vm0, %v46_v21 }
  0x2b   :  { %462 = vmatmul.mubr.msk.f32.gmra.mxu0 %vm67_vm0, %v35_v22  ;;  %480 = vmatmul.mubr.msk.f32.gmra.mxu1 %vm67_vm0, %v47_v23 }
  0x2c   :  { %464 = vmatprep.mubr.msk.f32.mxu0 %vm67_vm0, %v36_v24  ;;  %482 = vmatprep.mubr.msk.f32.mxu1 %vm67_vm0, %v48_v25 }
  0x2f   :  { %465 = vmatmul.mubr.msk.f32.gmra.mxu0 %vm67_vm0, %v37_v26  ;;  %483 = vmatmul.mubr.msk.f32.gmra.mxu1 %vm67_vm0, %v49_v27 }
  0x30   :  { %467 = vmatprep.mubr.msk.f32.mxu0 %vm67_vm0, %v38_v28  ;;  %485 = vmatprep.mubr.msk.f32.mxu1 %vm67_vm0, %v50_v29 }
  0x33   :  { %468 = vmatmul.mubr.msk.f32.gmra.mxu0 %vm67_vm0, %v39_v30  ;;  %486 = vmatmul.mubr.msk.f32.gmra.mxu1 %vm67_vm0, %v51_v31 }
  0xdf   :  { %v454_v33 = vpop.f32.mrf.mxu0  ;;  %v472_v34 = vpop.f32.mrf.mxu1 }
  0xe0   :  { %v212_v35 = vadd.f32 %v454_v33, %v606_v32  ;;  %v272_v36 = vadd.f32 %v472_v34, %v606_v32 }
  0xe1   :  { %v206_v37 = vpop.f32.mrf.mxu0  ;;  %v266_v38 = vpop.f32.mrf.mxu1 }
  0xe2   :  { %v326_v39 = vmax.f32 %v212_v35, 0.0  ;;  %v338_v40 = vmax.f32 %v272_v36, 0.0  ;;  %v207_v41 = vadd.f32 %v606_v32, %v206_v37  ;;  %v267_v42 = vadd.f32 %v606_v32, %v266_v38 }
  0xe3   :  { %v457_v43 = vpop.f32.mrf.mxu0  ;;  %v475_v44 = vpop.f32.mrf.mxu1 }
  0xe4   :  { %351 = vst.msk [vmem:[%s731_s3 + $0x8] sm:$0xff] %vm349_vm1, %v326_v39  ;;  %363 = vst.msk [vmem:[%s731_s3 + $0x68] sm:$0xff] %vm349_vm1, %v338_v40  ;;  %v325_v45 = vmax.f32 %v207_v41, 0.0  ;;  %v337_v46 = vmax.f32 %v267_v42, 0.0  ;;  %v222_v47 = vadd.f32 %v457_v43, %v606_v32  ;;  %v282_v48 = vadd.f32 %v475_v44, %v606_v32 }
  0xe5   :  { %v216_v49 = vpop.f32.mrf.mxu0  ;;  %v276_v50 = vpop.f32.mrf.mxu1 }
  0xe6   :  { %350 = vst.msk [vmem:[%s731_s3] sm:$0xff] %vm349_vm1, %v325_v45  ;;  %362 = vst.msk [vmem:[%s731_s3 + $0x60] sm:$0xff] %vm349_vm1, %v337_v46  ;;  %v328_v51 = vmax.f32 %v222_v47, 0.0  ;;  %v340_v52 = vmax.f32 %v282_v48, 0.0  ;;  %v217_v53 = vadd.f32 %v606_v32, %v216_v49  ;;  %v277_v54 = vadd.f32 %v606_v32, %v276_v50 }
  0xe7   :  { %v460_v55 = vpop.f32.mrf.mxu0  ;;  %v478_v56 = vpop.f32.mrf.mxu1 }
  0xe8   :  { %353 = vst.msk [vmem:[%s731_s3 + $0x18] sm:$0xff] %vm349_vm1, %v328_v51  ;;  %365 = vst.msk [vmem:[%s731_s3 + $0x78] sm:$0xff] %vm349_vm1, %v340_v52  ;;  %v327_v57 = vmax.f32 %v217_v53, 0.0  ;;  %v339_v58 = vmax.f32 %v277_v54, 0.0  ;;  %v232_v59 = vadd.f32 %v460_v55, %v606_v32  ;;  %v292_v60 = vadd.f32 %v478_v56, %v606_v32 }
  0xe9   :  { %v226_v61 = vpop.f32.mrf.mxu0  ;;  %v286_v62 = vpop.f32.mrf.mxu1 }
  0xea   :  { %352 = vst.msk [vmem:[%s731_s3 + $0x10] sm:$0xff] %vm349_vm1, %v327_v57  ;;  %364 = vst.msk [vmem:[%s731_s3 + $0x70] sm:$0xff] %vm349_vm1, %v339_v58  ;;  %v330_v63 = vmax.f32 %v232_v59, 0.0  ;;  %v342_v0 = vmax.f32 %v292_v60, 0.0  ;;  %v227_v1 = vadd.f32 %v606_v32, %v226_v61  ;;  %v287_v2 = vadd.f32 %v606_v32, %v286_v62 }
  0xeb   :  { %v463_v3 = vpop.f32.mrf.mxu0  ;;  %v481_v4 = vpop.f32.mrf.mxu1 }
  0xec   :  { %355 = vst.msk [vmem:[%s731_s3 + $0x28] sm:$0xff] %vm349_vm1, %v330_v63  ;;  %367 = vst.msk [vmem:[%s731_s3 + $0x88] sm:$0xff] %vm349_vm1, %v342_v0  ;;  %v329_v5 = vmax.f32 %v227_v1, 0.0  ;;  %v341_v6 = vmax.f32 %v287_v2, 0.0  ;;  %v242_v7 = vadd.f32 %v463_v3, %v606_v32  ;;  %v302_v8 = vadd.f32 %v481_v4, %v606_v32 }
  0xed   :  { %v236_v9 = vpop.f32.mrf.mxu0  ;;  %v296_v10 = vpop.f32.mrf.mxu1 }
  0xee   :  { %354 = vst.msk [vmem:[%s731_s3 + $0x20] sm:$0xff] %vm349_vm1, %v329_v5  ;;  %366 = vst.msk [vmem:[%s731_s3 + $0x80] sm:$0xff] %vm349_vm1, %v341_v6  ;;  %v332_v11 = vmax.f32 %v242_v7, 0.0  ;;  %v344_v12 = vmax.f32 %v302_v8, 0.0  ;;  %v237_v13 = vadd.f32 %v606_v32, %v236_v9  ;;  %v297_v14 = vadd.f32 %v606_v32, %v296_v10 }
  0xef   :  { %v466_v15 = vpop.f32.mrf.mxu0  ;;  %v484_v16 = vpop.f32.mrf.mxu1 }
  0xf0   :  { %357 = vst.msk [vmem:[%s731_s3 + $0x38] sm:$0xff] %vm349_vm1, %v332_v11  ;;  %369 = vst.msk [vmem:[%s731_s3 + $0x98] sm:$0xff] %vm349_vm1, %v344_v12  ;;  %v331_v17 = vmax.f32 %v237_v13, 0.0  ;;  %v343_v18 = vmax.f32 %v297_v14, 0.0  ;;  %v252_v19 = vadd.f32 %v466_v15, %v606_v32  ;;  %v312_v20 = vadd.f32 %v484_v16, %v606_v32 }
  0xf1   :  { %v246_v21 = vpop.f32.mrf.mxu0  ;;  %v306_v22 = vpop.f32.mrf.mxu1 }
  0xf2   :  { %356 = vst.msk [vmem:[%s731_s3 + $0x30] sm:$0xff] %vm349_vm1, %v331_v17  ;;  %368 = vst.msk [vmem:[%s731_s3 + $0x90] sm:$0xff] %vm349_vm1, %v343_v18  ;;  %v334_v23 = vmax.f32 %v252_v19, 0.0  ;;  %v346_v24 = vmax.f32 %v312_v20, 0.0  ;;  %v247_v25 = vadd.f32 %v606_v32, %v246_v21  ;;  %v307_v26 = vadd.f32 %v606_v32, %v306_v22 }
  0xf3   :  { %v469_v27 = vpop.f32.mrf.mxu0  ;;  %v487_v28 = vpop.f32.mrf.mxu1 }
  0xf4   :  { %359 = vst.msk [vmem:[%s731_s3 + $0x48] sm:$0xff] %vm349_vm1, %v334_v23  ;;  %371 = vst.msk [vmem:[%s731_s3 + $0xa8] sm:$0xff] %vm349_vm1, %v346_v24  ;;  %v333_v29 = vmax.f32 %v247_v25, 0.0  ;;  %v345_v30 = vmax.f32 %v307_v26, 0.0  ;;  %v262_v31 = vadd.f32 %v469_v27, %v606_v32  ;;  %v322_v33 = vadd.f32 %v487_v28, %v606_v32 }
  0xf5   :  { %v256_v34 = vpop.f32.mrf.mxu0  ;;  %v316_v35 = vpop.f32.mrf.mxu1 }
  0xf6   :  { %358 = vst.msk [vmem:[%s731_s3 + $0x40] sm:$0xff] %vm349_vm1, %v333_v29  ;;  %370 = vst.msk [vmem:[%s731_s3 + $0xa0] sm:$0xff] %vm349_vm1, %v345_v30  ;;  %v336_v36 = vmax.f32 %v262_v31, 0.0  ;;  %v348_v37 = vmax.f32 %v322_v33, 0.0  ;;  %v257_v38 = vadd.f32 %v606_v32, %v256_v34  ;;  %v317_v39 = vadd.f32 %v606_v32, %v316_v35 }
  0xf8   :  { %361 = vst.msk [vmem:[%s731_s3 + $0x58] sm:$0xff] %vm349_vm1, %v336_v36  ;;  %373 = vst.msk [vmem:[%s731_s3 + $0xb8] sm:$0xff] %vm349_vm1, %v348_v37  ;;  %v335_v40 = vmax.f32 %v257_v38, 0.0  ;;  %v347_v41 = vmax.f32 %v317_v39, 0.0 }
  0xfa   :  { %360 = vst.msk [vmem:[%s731_s3 + $0x50] sm:$0xff] %vm349_vm1, %v335_v40  ;;  %372 = vst.msk [vmem:[%s731_s3 + $0xb0] sm:$0xff] %vm349_vm1, %v347_v41 }
  0xfb   :  { %378 = vsyncpa [#allocation3], 1 }

</bundles_post_ra>
